<compile_context>
chip_gen: v7x
topology: tpu7x:2x2x1
jax: 0.10.0
libtpu: 0.0.40
codegen_flags: <defaults>
</compile_context>

<pallas_src>
import jax
import jax.numpy as jnp
from jax.experimental import pallas as pl
from jax.experimental.pallas import tpu as pltpu


def _round_up(n: int, m: int) -> int:
    return ((n + m - 1) // m) * m


def _cast_for_mxu(h, wdt):
    """Cast an activation to the MXU operand dtype only if it differs."""
    return h if h.dtype == wdt else h.astype(wdt)


def ae_kernel(x_ref,
              w1_ref, b1_ref,
              w2_ref, b2_ref,
              w3_ref, b3_ref,
              w4_ref, b4_ref,
              o_ref):
    """Fused 4-layer Linear+ReLU forward for one batch tile.

    Matmul operands are in the weights' dtype (bf16 by default); every matmul
    accumulates in f32 on the MXU; bias-add and ReLU run on the f32
    accumulator (works on all of v5e/v6e/v7x).
    """
    wdt = w1_ref.dtype
    layers = ((w1_ref, b1_ref), (w2_ref, b2_ref), (w3_ref, b3_ref), (w4_ref, b4_ref))

    # Feed the streamed x tile directly to the first matmul (no f32 upcast).
    h = _cast_for_mxu(x_ref[...], wdt)
    for li, (w_ref, b_ref) in enumerate(layers):
        acc = jnp.dot(h, w_ref[...], preferred_element_type=jnp.float32)
        acc = jnp.maximum(acc + b_ref[...], 0.0)        # ReLU after EVERY Linear
        # Keep the final layer's activations in f32 so the output cast is single-rounded.
        h = acc if li == len(layers) - 1 else _cast_for_mxu(acc, wdt)

    o_ref[...] = h.astype(o_ref.dtype)


def pad_params_for_lanes(params, lane=128):
    """Zero-pad intermediate layer widths (hidden, latent) to a multiple of `lane`.

    Numerically identical to the unpadded network: the extra units have zero
    weights and zero bias (ReLU(0) = 0) and the following layer has zero rows
    for them.  The input/output dimension D is left untouched.
    """
    n = len(params)
    padded = []
    prev_out_pad = 0
    for idx, (w, b) in enumerate(params):
        _, fan_out = w.shape
        out_pad = 0 if idx == n - 1 else _round_up(fan_out, lane) - fan_out
        w_p = jnp.pad(w, ((0, prev_out_pad), (0, out_pad)))
        b_p = jnp.pad(b, ((0, 0), (0, out_pad)))
        padded.append((w_p, b_p))
        prev_out_pad = out_pad
    return padded


def _vmem_budget_bytes() -> int:
    """Generation-aware scoped-VMEM budget (leave ~half of physical as headroom)."""
    try:
        phys = int(pltpu.get_tpu_info().vmem_capacity_bytes)
    except Exception:
        phys = 64 << 20  # conservative fallback: v7x per-TensorCore VMEM
    return max(16 << 20, min(phys // 2, 48 << 20))


def ae_forward(x, params, *, batch_tile=1024, compute_dtype=jnp.bfloat16):
    """Full AE forward with one pallas_call tiled over the batch dimension.

    x: (B, D) with D = c_in * w_in**2 (f32 or bf16).
    params: list of 4 (W, b) with W shape (in_features, out_features),
            b shape (1, out_features)  [== PyTorch y = x @ W_pt.T + b].
    compute_dtype: MXU operand dtype for weights/activations (accumulation is
            always f32).  jnp.bfloat16 (default, fastest) or jnp.float32
            (bit-matches an f32 PyTorch forward).
    """
    (w1, b1), (w2, b2), (w3, b3), (w4, b4) = pad_params_for_lanes(params)

    wdt = jnp.dtype(compute_dtype)
    # Weights in the MXU operand dtype; biases stay f32 (added to the f32 acc).
    ws = tuple(w.astype(wdt) for w in (w1, w2, w3, w4))
    bs = tuple(b.astype(jnp.float32) for b in (b1, b2, b3, b4))
    weights = (ws[0], bs[0], ws[1], bs[1], ws[2], bs[2], ws[3], bs[3])

    B, D = x.shape
    assert ws[0].shape[0] == D and ws[3].shape[1] == D, "param shapes do not match input dim"

    # ---- batch-tile selection -------------------------------------------------
    # Sublane minimum: 8 rows for f32 tiles, 16 for bf16 tiles.
    sub_min = 16 if x.dtype == jnp.bfloat16 else 8
    dsize = jnp.dtype(x.dtype).itemsize

    # VMEM-aware cap on the tile: streamed x/out are double-buffered, plus ~4
    # live f32 activation temporaries per row inside the kernel, plus the
    # (double-buffered) resident params.
    vmem_budget = _vmem_budget_bytes()
    maxw = max(D, *(int(w.shape[1]) for w in ws))
    weight_bytes = sum(int(a.size) * jnp.dtype(a.dtype).itemsize for a in weights)
    per_row_bytes = 2 * 2 * D * dsize + 4 * maxw * 4
    budget = max(vmem_budget - 2 * weight_bytes - (2 << 20), per_row_bytes * sub_min)
    bt_vmem_cap = max(sub_min, (budget // per_row_bytes) // sub_min * sub_min)

    max_bt = min(batch_tile, bt_vmem_cap)
    max_bt = max(sub_min, (max_bt // sub_min) * sub_min)

    # Minimize pad rows for ragged batches, but keep >= 2 grid steps for
    # batches large enough to split so both v7x TensorCores participate.
    n_steps = pl.cdiv(B, max_bt)
    if B >= 256:
        n_steps = max(n_steps, 2)
    bt = min(_round_up(pl.cdiv(B, n_steps), sub_min), max_bt)

    b_padded = _round_up(B, bt)
    x_p = x if b_padded == B else jnp.pad(x, ((0, b_padded - B), (0, 0)))
    grid = (b_padded // bt,)
    # ---------------------------------------------------------------------------

    def resident(arr):
        # Whole (tiny) array resident in VMEM; constant block index -> fetched once.
        zeros = (0,) * arr.ndim
        return pl.BlockSpec(arr.shape, lambda i, _z=zeros: _z)

    flops = 2 * b_padded * sum(int(w.shape[0]) * int(w.shape[1]) for w in ws)
    bytes_accessed = (2 * b_padded * D * dsize + weight_bytes)

    out_p = pl.pallas_call(
        ae_kernel,
        out_shape=jax.ShapeDtypeStruct((b_padded, D), x.dtype),
        grid_spec=pltpu.PrefetchScalarGridSpec(
            num_scalar_prefetch=0,
            grid=grid,
            in_specs=[pl.BlockSpec((bt, D), lambda i: (i, 0))]   # streamed x tile
                     + [resident(a) for a in weights],           # resident params
            out_specs=pl.BlockSpec((bt, D), lambda i: (i, 0)),
        ),
        compiler_params=pltpu.CompilerParams(
            dimension_semantics=("parallel",),   # batch axis shards across v7x's 2 TCs
            vmem_limit_bytes=int(vmem_budget),   # raise v5e's 16 MiB default; safe on v7x
        ),
        cost_estimate=pl.CostEstimate(
            flops=flops, transcendentals=0, bytes_accessed=bytes_accessed),
    )(x_p, *weights)

    return out_p[:B] if b_padded != B else out_p


def init_ae_params(key, c_in=1, w_in=16, latent_dim=8, hidden_dims=None,
                   dtype=jnp.float32):
    """Deterministic synthetic init matching the AE layer shapes.

    Weights are stored as (in_features, out_features) so the kernel computes
    y = x @ W + b, semantically identical to PyTorch's y = x @ W_pt.T + b.
    """
    if hidden_dims is None:
        hidden_dims = [64]
    D = c_in * w_in ** 2
    enc_dims = [D] + list(hidden_dims) + [latent_dim]
    dec_dims = list(reversed(enc_dims))
    layer_dims = list(zip(enc_dims[:-1], enc_dims[1:])) + \
                 list(zip(dec_dims[:-1], dec_dims[1:]))

    params = []
    for (fan_in, fan_out) in layer_dims:
        key, kw, kb = jax.random.split(key, 3)
        bound = 1.0 / jnp.sqrt(fan_in)  # PyTorch Linear default init range
        w = jax.random.uniform(kw, (fan_in, fan_out), dtype, -bound, bound)
        b = jax.random.uniform(kb, (1, fan_out), dtype, -bound, bound)
        params.append((w, b))
    return params, D


def ae_reference(x, params):
    """Pure-JAX f32 reference of the same forward pass (unpadded params)."""
    h = x
    for (w, b) in params:
        h = jnp.maximum(h @ w + b, 0.0)
    return h


if __name__ == "__main__":
    key = jax.random.PRNGKey(0)

    C_IN, W_IN, LATENT, HIDDEN = 1, 16, 8, [64]
    BATCH = 4

    kp, kx, kx2 = jax.random.split(key, 3)
    params, D = init_ae_params(kp, c_in=C_IN, w_in=W_IN,
                               latent_dim=LATENT, hidden_dims=HIDDEN)

    # Small (B, C, H, W) image batch, flattened to (B, C*H*W) as nn.Linear sees it.
    x_img = jax.random.normal(kx, (BATCH, C_IN, W_IN, W_IN), dtype=jnp.float32)
    x = x_img.reshape(BATCH, -1)
    ref = ae_reference(x, params)

    # --- exact f32 path (compute_dtype=f32), tiny batch (tile shrinks to 8) ---
    out_f32 = jax.block_until_ready(ae_forward(x, params, compute_dtype=jnp.float32))
    assert out_f32.shape == (BATCH, D)
    assert jnp.allclose(out_f32, ref, atol=1e-5, rtol=1e-5), "f32 mismatch vs reference"

    # --- default fast path (bf16 MXU operands, f32 accumulation) ---
    out_fast = jax.block_until_ready(ae_forward(x, params))
    assert jnp.allclose(out_fast, ref, atol=5e-2, rtol=5e-2), \
        "bf16-weight path mismatch vs reference"

    # --- ragged larger batch (exercises minimal-pad tiling + 2 'parallel' steps) ---
    B2 = 300
    x2 = jax.random.normal(kx2, (B2, D), dtype=jnp.float32)
    ref2 = ae_reference(x2, params)
    out2 = jax.block_until_ready(ae_forward(x2, params, compute_dtype=jnp.float32))
    assert out2.shape == (B2, D)
    assert jnp.allclose(out2, ref2, atol=1e-5, rtol=1e-5), "ragged-batch mismatch vs reference"
    out2_fast = jax.block_until_ready(ae_forward(x2, params))
    assert jnp.allclose(out2_fast, ref2, atol=5e-2, rtol=5e-2), \
        "ragged bf16-weight path mismatch vs reference"

    # --- bf16 I/O path (bf16 straight into the MXU, f32 accumulation) ---
    x_bf16 = x.astype(jnp.bfloat16)
    out_bf16 = jax.block_until_ready(ae_forward(x_bf16, params))
    ref_bf16 = ae_reference(x_bf16.astype(jnp.float32), params)
    assert out_bf16.dtype == jnp.bfloat16 and out_bf16.shape == (BATCH, D)
    assert jnp.allclose(out_bf16.astype(jnp.float32), ref_bf16,
                        atol=5e-2, rtol=5e-2), "bf16 I/O mismatch vs reference"

    print("KERNEL_OK")
</pallas_src>

<mosaic_0001>
module attributes {stable_mosaic.version = 11 : i64} {
  func.func @ae_kernel(%arg0: i32, %arg1: memref<8x256xf32, #tpu.memory_space<vmem>>, %arg2: memref<256x128xf32, #tpu.memory_space<vmem>>, %arg3: memref<1x128xf32, #tpu.memory_space<vmem>>, %arg4: memref<128x128xf32, #tpu.memory_space<vmem>>, %arg5: memref<1x128xf32, #tpu.memory_space<vmem>>, %arg6: memref<128x128xf32, #tpu.memory_space<vmem>>, %arg7: memref<1x128xf32, #tpu.memory_space<vmem>>, %arg8: memref<128x256xf32, #tpu.memory_space<vmem>>, %arg9: memref<1x256xf32, #tpu.memory_space<vmem>>, %arg10: memref<8x256xf32, #tpu.memory_space<vmem>>) attributes {dimension_semantics = [#tpu.dimension_semantics<parallel>], iteration_bounds = array<i64: 1>, scalar_prefetch = 0 : i64, scratch_operands = 0 : i64, tpu.core_type = #tpu.core_type<tc>, window_params = [{transform_indices = @transform_0, window_bounds = array<i64: 8, 256>}, {pipeline_mode = #tpu.pipeline_mode<synchronous>, transform_indices = @transform_1, window_bounds = array<i64: 256, 128>}, {pipeline_mode = #tpu.pipeline_mode<synchronous>, transform_indices = @transform_2, window_bounds = array<i64: 1, 128>}, {pipeline_mode = #tpu.pipeline_mode<synchronous>, transform_indices = @transform_3, window_bounds = array<i64: 128, 128>}, {pipeline_mode = #tpu.pipeline_mode<synchronous>, transform_indices = @transform_4, window_bounds = array<i64: 1, 128>}, {pipeline_mode = #tpu.pipeline_mode<synchronous>, transform_indices = @transform_5, window_bounds = array<i64: 128, 128>}, {pipeline_mode = #tpu.pipeline_mode<synchronous>, transform_indices = @transform_6, window_bounds = array<i64: 1, 128>}, {pipeline_mode = #tpu.pipeline_mode<synchronous>, transform_indices = @transform_7, window_bounds = array<i64: 128, 256>}, {pipeline_mode = #tpu.pipeline_mode<synchronous>, transform_indices = @transform_8, window_bounds = array<i64: 1, 256>}, {transform_indices = @transform_9, window_bounds = array<i64: 8, 256>}]} {
    %c0 = arith.constant 0 : index
    %c0_0 = arith.constant 0 : index
    %0 = vector.load %arg1[%c0, %c0_0] : memref<8x256xf32, #tpu.memory_space<vmem>>, vector<8x256xf32>
    %c0_1 = arith.constant 0 : index
    %c0_2 = arith.constant 0 : index
    %1 = vector.load %arg2[%c0_1, %c0_2] : memref<256x128xf32, #tpu.memory_space<vmem>>, vector<256x128xf32>
    %cst = arith.constant dense<0.000000e+00> : vector<8x128xf32>
    %2 = tpu.matmul %0, %1, %cst {dimension_numbers = #tpu.dot_dimension_numbers<[1], [0], [0], [1], [0, 0, 1, 1], [], []>} : vector<8x256xf32>, vector<256x128xf32>, vector<8x128xf32> -> vector<8x128xf32>
    %c0_3 = arith.constant 0 : index
    %c0_4 = arith.constant 0 : index
    %3 = vector.load %arg3[%c0_3, %c0_4] : memref<1x128xf32, #tpu.memory_space<vmem>>, vector<1x128xf32>
    %4 = vector.broadcast %3 : vector<1x128xf32> to vector<8x128xf32>
    %5 = arith.addf %2, %4 : vector<8x128xf32>
    %cst_5 = arith.constant 0.000000e+00 : f32
    %6 = vector.broadcast %cst_5 : f32 to vector<8x128xf32>
    %7 = arith.maximumf %5, %6 : vector<8x128xf32>
    %c0_6 = arith.constant 0 : index
    %c0_7 = arith.constant 0 : index
    %8 = vector.load %arg4[%c0_6, %c0_7] : memref<128x128xf32, #tpu.memory_space<vmem>>, vector<128x128xf32>
    %cst_8 = arith.constant dense<0.000000e+00> : vector<8x128xf32>
    %9 = tpu.matmul %7, %8, %cst_8 {dimension_numbers = #tpu.dot_dimension_numbers<[1], [0], [0], [1], [0, 0, 1, 1], [], []>} : vector<8x128xf32>, vector<128x128xf32>, vector<8x128xf32> -> vector<8x128xf32>
    %c0_9 = arith.constant 0 : index
    %c0_10 = arith.constant 0 : index
    %10 = vector.load %arg5[%c0_9, %c0_10] : memref<1x128xf32, #tpu.memory_space<vmem>>, vector<1x128xf32>
    %11 = vector.broadcast %10 : vector<1x128xf32> to vector<8x128xf32>
    %12 = arith.addf %9, %11 : vector<8x128xf32>
    %cst_11 = arith.constant 0.000000e+00 : f32
    %13 = vector.broadcast %cst_11 : f32 to vector<8x128xf32>
    %14 = arith.maximumf %12, %13 : vector<8x128xf32>
    %c0_12 = arith.constant 0 : index
    %c0_13 = arith.constant 0 : index
    %15 = vector.load %arg6[%c0_12, %c0_13] : memref<128x128xf32, #tpu.memory_space<vmem>>, vector<128x128xf32>
    %cst_14 = arith.constant dense<0.000000e+00> : vector<8x128xf32>
    %16 = tpu.matmul %14, %15, %cst_14 {dimension_numbers = #tpu.dot_dimension_numbers<[1], [0], [0], [1], [0, 0, 1, 1], [], []>} : vector<8x128xf32>, vector<128x128xf32>, vector<8x128xf32> -> vector<8x128xf32>
    %c0_15 = arith.constant 0 : index
    %c0_16 = arith.constant 0 : index
    %17 = vector.load %arg7[%c0_15, %c0_16] : memref<1x128xf32, #tpu.memory_space<vmem>>, vector<1x128xf32>
    %18 = vector.broadcast %17 : vector<1x128xf32> to vector<8x128xf32>
    %19 = arith.addf %16, %18 : vector<8x128xf32>
    %cst_17 = arith.constant 0.000000e+00 : f32
    %20 = vector.broadcast %cst_17 : f32 to vector<8x128xf32>
    %21 = arith.maximumf %19, %20 : vector<8x128xf32>
    %c0_18 = arith.constant 0 : index
    %c0_19 = arith.constant 0 : index
    %22 = vector.load %arg8[%c0_18, %c0_19] : memref<128x256xf32, #tpu.memory_space<vmem>>, vector<128x256xf32>
    %cst_20 = arith.constant dense<0.000000e+00> : vector<8x256xf32>
    %23 = tpu.matmul %21, %22, %cst_20 {dimension_numbers = #tpu.dot_dimension_numbers<[1], [0], [0], [1], [0, 0, 1, 1], [], []>} : vector<8x128xf32>, vector<128x256xf32>, vector<8x256xf32> -> vector<8x256xf32>
    %c0_21 = arith.constant 0 : index
    %c0_22 = arith.constant 0 : index
    %24 = vector.load %arg9[%c0_21, %c0_22] : memref<1x256xf32, #tpu.memory_space<vmem>>, vector<1x256xf32>
    %25 = vector.broadcast %24 : vector<1x256xf32> to vector<8x256xf32>
    %26 = arith.addf %23, %25 : vector<8x256xf32>
    %cst_23 = arith.constant 0.000000e+00 : f32
    %27 = vector.broadcast %cst_23 : f32 to vector<8x256xf32>
    %28 = arith.maximumf %26, %27 : vector<8x256xf32>
    %c0_24 = arith.constant 0 : index
    %c0_25 = arith.constant 0 : index
    %29 = vector.load %arg10[%c0_24, %c0_25] : memref<8x256xf32, #tpu.memory_space<vmem>>, vector<8x256xf32>
    tpu.vector_store %arg10[%c0_24, %c0_25], %28 {strides = array<i32>} : memref<8x256xf32, #tpu.memory_space<vmem>>, vector<8x256xf32>,
    return
  }
  func.func @transform_0(%arg0: i32) -> (i32, i32) {
    %c0_i32 = arith.constant 0 : i32
    %c0_i32_0 = arith.constant 0 : i32
    return %arg0, %c0_i32 : i32, i32
  }
  func.func @transform_1(%arg0: i32) -> (i32, i32) {
    %c0_i32 = arith.constant 0 : i32
    %c0_i32_0 = arith.constant 0 : i32
    %c0_i32_1 = arith.constant 0 : i32
    return %c0_i32, %c0_i32_0 : i32, i32
  }
  func.func @transform_2(%arg0: i32) -> (i32, i32) {
    %c0_i32 = arith.constant 0 : i32
    %c0_i32_0 = arith.constant 0 : i32
    %c0_i32_1 = arith.constant 0 : i32
    return %c0_i32, %c0_i32_0 : i32, i32
  }
  func.func @transform_3(%arg0: i32) -> (i32, i32) {
    %c0_i32 = arith.constant 0 : i32
    %c0_i32_0 = arith.constant 0 : i32
    %c0_i32_1 = arith.constant 0 : i32
    return %c0_i32, %c0_i32_0 : i32, i32
  }
  func.func @transform_4(%arg0: i32) -> (i32, i32) {
    %c0_i32 = arith.constant 0 : i32
    %c0_i32_0 = arith.constant 0 : i32
    %c0_i32_1 = arith.constant 0 : i32
    return %c0_i32, %c0_i32_0 : i32, i32
  }
  func.func @transform_5(%arg0: i32) -> (i32, i32) {
    %c0_i32 = arith.constant 0 : i32
    %c0_i32_0 = arith.constant 0 : i32
    %c0_i32_1 = arith.constant 0 : i32
    return %c0_i32, %c0_i32_0 : i32, i32
  }
  func.func @transform_6(%arg0: i32) -> (i32, i32) {
    %c0_i32 = arith.constant 0 : i32
    %c0_i32_0 = arith.constant 0 : i32
    %c0_i32_1 = arith.constant 0 : i32
    return %c0_i32, %c0_i32_0 : i32, i32
  }
  func.func @transform_7(%arg0: i32) -> (i32, i32) {
    %c0_i32 = arith.constant 0 : i32
    %c0_i32_0 = arith.constant 0 : i32
    %c0_i32_1 = arith.constant 0 : i32
    return %c0_i32, %c0_i32_0 : i32, i32
  }
  func.func @transform_8(%arg0: i32) -> (i32, i32) {
    %c0_i32 = arith.constant 0 : i32
    %c0_i32_0 = arith.constant 0 : i32
    %c0_i32_1 = arith.constant 0 : i32
    return %c0_i32, %c0_i32_0 : i32, i32
  }
  func.func @transform_9(%arg0: i32) -> (i32, i32) {
    %c0_i32 = arith.constant 0 : i32
    %c0_i32_0 = arith.constant 0 : i32
    return %arg0, %c0_i32 : i32, i32
  }
}

</mosaic_0001>

<bundles_post_ra>
// kernel: tpu_custom_call.1
= control target key start
LH: loop header
LB: loop body
LE: loop exit
PB: predicated region body
PF: predicated region fallthrough
CT: control target
= control target key end

     0   :  { %14 = vsyncpa [#allocation3], 0  ;;  %s1114_s0 = inlined_call_operand.hbm [shape: f32[8,256], index: 0, kind: input, shape index: {}]   ;;  %s1115_s1 = inlined_call_operand.hbm [shape: f32[256,128], index: 1, kind: input, shape index: {}]   ;;  %s1116_s2 = inlined_call_operand.vmem [shape: f32[1,128], index: 2, kind: input, shape index: {}]   ;;  %s1117_s3 = inlined_call_operand.hbm [shape: f32[128,128], index: 3, kind: input, shape index: {}]   ;;  %s1118_s4 = inlined_call_operand.vmem [shape: f32[1,128], index: 4, kind: input, shape index: {}]   ;;  %s1119_s5 = inlined_call_operand.hbm [shape: f32[128,128], index: 5, kind: input, shape index: {}]   ;;  %s1120_s6 = inlined_call_operand.vmem [shape: f32[1,128], index: 6, kind: input, shape index: {}]   ;;  %s1121_s7 = inlined_call_operand.hbm [shape: f32[128,256], index: 7, kind: input, shape index: {}]   ;;  %s1122_s8 = inlined_call_operand.vmem [shape: f32[1,256], index: 8, kind: input, shape index: {}]   ;;  %s1123_s9 = inlined_call_operand.hbm [shape: f32[8,256], index: 9, kind: output, shape index: {}]  }
   0x1   :  { %15 = vsyncpa [#allocation6], 0 }
   0x2   :  { %16 = vsyncpa [#allocation9], 0 }
   0x3   :  { %17 = vsyncpa [#allocation4], 0  ;;  %s942_s30 = smov [#allocation5]   ;;  %s802_s13 = scalar_lea.hbm %s1115_s1, 4096 }
   0x4   :  { %s33_s10 = sshll.u32 %s942_s30, 4  ;;  %p803_p0 = scmp.ne.s32.totalorder %s1115_s1, %s802_s13  ;;  %s34_s10 = int_to_ptr.vmem [resolvable:$true] %s33_s10 }
   0x5   :  { %p806_p1 = scmp.lt.u32.totalorder %s802_s13, %s1115_s1 }
   0x7   :  { %p808_p2 = pnand %p806_p1, %p803_p0 }
   0x9   :  { %811 = shalt.err (!%p808_p2)
}
   0xa   :  { %s812_s18 = scalar_lea.vmem %s34_s10, 4096  ;;  %p817_p4 = scmp.lt.s32.totalorder %s34_s10, %s34_s10 }
   0xb   :  { %p813_p3 = scmp.ne.s32.totalorder %s34_s10, %s812_s18  ;;  %p818_p5 = scmp.lt.s32.totalorder %s812_s18, %s812_s18 }
   0xd   :  { %p819_p6 = por %p818_p5, %p817_p4 }
   0xf   :  { %p820_p7 = pnand %p819_p6, %p813_p3 }
  0x11   :  { %823 = shalt.err (!%p820_p7)
}
  0x12   :  { %s943_s19 = smov 128   ;;  %s944_s20 = smov 8  }
  0x13   :  { %39 = dma.hbm_to_vmem [thread:$0]  %s1115_s1, 4096, %s34_s10, [#allocation6], %s943_s19, %s943_s19, %s944_s20  }
  0x14   :  { %s945_s23 = smov [#allocation8]   ;;  %s946_s25 = smov [#allocation2]  }
  0x15   :  { %s61_s24 = sshll.u32 %s945_s23, 4  ;;  %s24_s26 = sshll.u32 %s946_s25, 4  ;;  %s62_s24 = int_to_ptr.vmem [resolvable:$true] %s61_s24  ;;  %s25_s26 = int_to_ptr.vmem [resolvable:$true] %s24_s26 }
  0x16   :  { %s824_s29 = scalar_lea.hbm %s1119_s5, 2048 }
  0x17   :  { %p825_p8 = scmp.ne.s32.totalorder %s1119_s5, %s824_s29  ;;  %p828_p9 = scmp.lt.u32.totalorder %s824_s29, %s1119_s5 }
  0x19   :  { %p830_p10 = pnand %p828_p9, %p825_p8 }
  0x1b   :  { %833 = shalt.err (!%p830_p10)
}
  0x1c   :  { %s834_s1 = scalar_lea.vmem %s62_s24, 2048  ;;  %p839_p12 = scmp.lt.s32.totalorder %s62_s24, %s62_s24 }
  0x1d   :  { %p835_p11 = scmp.ne.s32.totalorder %s62_s24, %s834_s1  ;;  %p840_p13 = scmp.lt.s32.totalorder %s834_s1, %s834_s1 }
  0x1f   :  { %p841_p0 = por %p840_p13, %p839_p12 }
  0x21   :  { %p842_p1 = pnand %p841_p0, %p835_p11 }
  0x23   :  { %845 = shalt.err (!%p842_p1)
}
  0x24   :  { %67 = dma.hbm_to_vmem [thread:$0]  %s1119_s5, 2048, %s62_s24, [#allocation9], %s943_s19, %s943_s19, %s944_s20  }
  0x25   :  { %s846_s17 = scalar_lea.hbm %s1114_s0, 256 }
  0x26   :  { %p847_p2 = scmp.ne.s32.totalorder %s1114_s0, %s846_s17  ;;  %p850_p3 = scmp.lt.u32.totalorder %s846_s17, %s1114_s0 }
  0x28   :  { %p852_p4 = pnand %p850_p3, %p847_p2 }
  0x2a   :  { %855 = shalt.err (!%p852_p4)
}
  0x2b   :  { %s856_s25 = scalar_lea.vmem %s25_s26, 256  ;;  %p861_p6 = scmp.lt.s32.totalorder %s25_s26, %s25_s26 }
  0x2c   :  { %p857_p5 = scmp.ne.s32.totalorder %s25_s26, %s856_s25  ;;  %p862_p7 = scmp.lt.s32.totalorder %s856_s25, %s856_s25 }
  0x2e   :  { %p863_p8 = por %p862_p7, %p861_p6 }
  0x30   :  { %p864_p9 = pnand %p863_p8, %p857_p5 }
  0x32   :  { %867 = shalt.err (!%p864_p9)
}
  0x33   :  { %27 = dma.hbm_to_vmem [thread:$0]  %s1114_s0, 256, %s25_s26, [#allocation3]  }
  0x34   :  { %s947_s27 = smov [#allocation7]   ;;  %s948_s29 = smov [#allocation10]  }
  0x35   :  { %s47_s28 = sshll.u32 %s947_s27, 4  ;;  %s75_s30 = sshll.u32 %s948_s29, 4  ;;  %s48_s28 = int_to_ptr.vmem [resolvable:$true] %s47_s28  ;;  %s76_s30 = int_to_ptr.vmem [resolvable:$true] %s75_s30 }
  0x36   :  { %s868_s13 = scalar_lea.hbm %s1117_s3, 2048 }
  0x37   :  { %p869_p10 = scmp.ne.s32.totalorder %s1117_s3, %s868_s13  ;;  %p872_p11 = scmp.lt.u32.totalorder %s868_s13, %s1117_s3 }
  0x39   :  { %p874_p12 = pnand %p872_p11, %p869_p10 }
  0x3b   :  { %877 = shalt.err (!%p874_p12)
}
  0x3c   :  { %s878_s0 = scalar_lea.vmem %s48_s28, 2048  ;;  %p883_p0 = scmp.lt.s32.totalorder %s48_s28, %s48_s28 }
  0x3d   :  { %p879_p13 = scmp.ne.s32.totalorder %s48_s28, %s878_s0  ;;  %p884_p1 = scmp.lt.s32.totalorder %s878_s0, %s878_s0 }
  0x3f   :  { %p885_p2 = por %p884_p1, %p883_p0 }
  0x41   :  { %p886_p3 = pnand %p885_p2, %p879_p13 }
  0x43   :  { %889 = shalt.err (!%p886_p3)
}
  0x44   :  { %53 = dma.hbm_to_vmem [thread:$0]  %s1117_s3, 2048, %s48_s28, [#allocation6], %s943_s19, %s943_s19, %s944_s20  }
  0x45   :  { %s890_s21 = scalar_lea.hbm %s1121_s7, 4096 }
  0x46   :  { %p891_p4 = scmp.ne.s32.totalorder %s1121_s7, %s890_s21  ;;  %p894_p5 = scmp.lt.u32.totalorder %s890_s21, %s1121_s7 }
  0x48   :  { %p896_p6 = pnand %p894_p5, %p891_p4 }
  0x4a   :  { %899 = shalt.err (!%p896_p6)
}
  0x4b   :  { %s900_s24 = scalar_lea.vmem %s76_s30, 4096  ;;  %p905_p8 = scmp.lt.s32.totalorder %s76_s30, %s76_s30 }
  0x4c   :  { %p901_p7 = scmp.ne.s32.totalorder %s76_s30, %s900_s24  ;;  %p906_p9 = scmp.lt.s32.totalorder %s900_s24, %s900_s24 }
  0x4e   :  { %p907_p10 = por %p906_p9, %p905_p8 }
  0x50   :  { %p908_p11 = pnand %p907_p10, %p901_p7 }
  0x52   :  { %911 = shalt.err (!%p908_p11)
}
  0x53   :  { %s949_s3 = smov 256   ;;  %s950_s19 = smov 16  }
  0x54   :  { %81 = dma.hbm_to_vmem [thread:$0]  %s1121_s7, 4096, %s76_s30, [#allocation9], %s949_s3, %s949_s3, %s950_s19  }
  0x55   :  { %934 = dma.done.wait [#allocation3], 256  }
  0x56   :  { %935 = vsyncadd [#allocation3], 4294967040 }
  0x57   :  { %936 = dma.done.wait [#allocation6], 6144  }
  0x58   :  { %937 = vsyncadd [#allocation6], 4294961152 }
  0x59   :  { %938 = dma.done.wait [#allocation9], 6144  }
  0x5a   :  { %939 = vsyncadd [#allocation9], 4294961152  ;;  %v951_v0 = vmov 0.0|0.0   ;;  %v117_v1 = vld [vmem:[#allocation5 + $0x80] sm:$0xff]  ;;  %v118_v2 = vld [vmem:[#allocation5 + $0x88] sm:$0xff]  ;;  %vm952_vm0 = vmmov 0  }
  0x5b   :  { %709 = vmatprep.subr.bf16.mxu1 %v951_v0  ;;  %v101_v3 = vld [vmem:[#allocation5] sm:$0xff]  ;;  %v677_v4 = vpack.c.bf16 %v118_v2, %v117_v1  ;;  %v102_v5 = vld [vmem:[#allocation5 + $0x8] sm:$0xff]  ;;  %v119_v6 = vld [vmem:[#allocation5 + $0x90] sm:$0xff]  ;;  %s954_s13 = smov [#allocation11]  }
  0x5c   :  { %v120_v7 = vld [vmem:[#allocation5 + $0x98] sm:$0xff]  ;;  %v679_v8 = vpack.c.bf16 %v102_v5, %v101_v3  ;;  %v103_v10 = vld [vmem:[#allocation5 + $0x10] sm:$0xff]  ;;  %v121_v12 = vld [vmem:[#allocation5 + $0xa0] sm:$0xff] }
  0x5d   :  { %v681_v9 = vpack.c.bf16 %v120_v7, %v119_v6  ;;  %v104_v11 = vld [vmem:[#allocation5 + $0x18] sm:$0xff]  ;;  %678 = vmatprep.subr.bf16.mxu0 %v677_v4  ;;  %v122_v13 = vld [vmem:[#allocation5 + $0xa8] sm:$0xff]  ;;  %v105_v16 = vld [vmem:[#allocation5 + $0x20] sm:$0xff] }
  0x5e   :  { %680 = vmatpush3.bf16.msra.mxu0 %v679_v8  ;;  %v683_v14 = vpack.c.bf16 %v104_v11, %v103_v10  ;;  %v685_v15 = vpack.c.bf16 %v122_v13, %v121_v12  ;;  %v106_v17 = vld [vmem:[#allocation5 + $0x28] sm:$0xff]  ;;  %v123_v18 = vld [vmem:[#allocation5 + $0xb0] sm:$0xff]  ;;  %v124_v19 = vld [vmem:[#allocation5 + $0xb8] sm:$0xff]  ;;  %v953_v12 = vmov 0.0  }
  0x5f   :  { %682 = vmatprep.subr.bf16.mxu0 %v681_v9  ;;  %v687_v20 = vpack.c.bf16 %v106_v17, %v105_v16  ;;  %v689_v21 = vpack.c.bf16 %v124_v19, %v123_v18  ;;  %v107_v22 = vld [vmem:[#allocation5 + $0x30] sm:$0xff]  ;;  %v108_v23 = vld [vmem:[#allocation5 + $0x38] sm:$0xff]  ;;  %v125_v24 = vld [vmem:[#allocation5 + $0xc0] sm:$0xff]  ;;  %639 = vmatprep.mubr.msk.f32.mxu1 %vm952_vm0, %v953_v12 }
  0x60   :  { %v126_v25 = vld [vmem:[#allocation5 + $0xc8] sm:$0xff]  ;;  %v100_v26 = vld [vmem:[#allocation2 + $0x8] sm:$0xff]  ;;  %v211_v27 = vld [vmem:[#allocation7] sm:$0xff]  ;;  %v691_v29 = vpack.c.bf16 %v108_v23, %v107_v22 }
  0x61   :  { %204 = vmatprep.mubr.f32.mxu0 %v100_v26  ;;  %v212_v28 = vld [vmem:[#allocation7 + $0x8] sm:$0xff]  ;;  %v213_v31 = vld [vmem:[#allocation7 + $0x10] sm:$0xff]  ;;  %v214_v32 = vld [vmem:[#allocation7 + $0x18] sm:$0xff]  ;;  %v693_v33 = vpack.c.bf16 %v126_v25, %v125_v24 }
  0x62   :  { %684 = vmatpush3.bf16.msra.mxu0 %v683_v14  ;;  %v710_v30 = vpack.c.bf16 %v212_v28, %v211_v27  ;;  %v109_v34 = vld [vmem:[#allocation5 + $0x40] sm:$0xff]  ;;  %v110_v35 = vld [vmem:[#allocation5 + $0x48] sm:$0xff]  ;;  %v127_v36 = vld [vmem:[#allocation5 + $0xd0] sm:$0xff]  ;;  %v713_v38 = vpack.c.bf16 %v214_v32, %v213_v31 }
  0x63   :  { %686 = vmatprep.subr.bf16.mxu0 %v685_v15  ;;  %v128_v37 = vld [vmem:[#allocation5 + $0xd8] sm:$0xff]  ;;  %v215_v39 = vld [vmem:[#allocation7 + $0x20] sm:$0xff]  ;;  %v216_v40 = vld [vmem:[#allocation7 + $0x28] sm:$0xff]  ;;  %v695_v41 = vpack.c.bf16 %v110_v35, %v109_v34 }
  0x64   :  { %711 = vmatpush3.bf16.msra.mxu1 %v710_v30  ;;  %v697_v42 = vpack.c.bf16 %v128_v37, %v127_v36  ;;  %v111_v43 = vld [vmem:[#allocation5 + $0x50] sm:$0xff]  ;;  %v112_v44 = vld [vmem:[#allocation5 + $0x58] sm:$0xff]  ;;  %v129_v45 = vld [vmem:[#allocation5 + $0xe0] sm:$0xff]  ;;  %v716_v47 = vpack.c.bf16 %v216_v40, %v215_v39 }
  0x65   :  { %712 = vmatprep.subr.bf16.mxu1 %v951_v0  ;;  %v130_v46 = vld [vmem:[#allocation5 + $0xe8] sm:$0xff]  ;;  %v217_v48 = vld [vmem:[#allocation7 + $0x30] sm:$0xff]  ;;  %v218_v49 = vld [vmem:[#allocation7 + $0x38] sm:$0xff]  ;;  %v699_v50 = vpack.c.bf16 %v112_v44, %v111_v43 }
  0x66   :  { %688 = vmatpush3.bf16.msra.mxu0 %v687_v20  ;;  %v701_v51 = vpack.c.bf16 %v130_v46, %v129_v45  ;;  %v113_v52 = vld [vmem:[#allocation5 + $0x60] sm:$0xff]  ;;  %v114_v53 = vld [vmem:[#allocation5 + $0x68] sm:$0xff]  ;;  %v131_v54 = vld [vmem:[#allocation5 + $0xf0] sm:$0xff]  ;;  %v719_v56 = vpack.c.bf16 %v218_v49, %v217_v48 }
  0x67   :  { %690 = vmatprep.subr.bf16.mxu0 %v689_v21  ;;  %v132_v55 = vld [vmem:[#allocation5 + $0xf8] sm:$0xff]  ;;  %v219_v57 = vld [vmem:[#allocation7 + $0x40] sm:$0xff]  ;;  %v220_v58 = vld [vmem:[#allocation7 + $0x48] sm:$0xff]  ;;  %v703_v59 = vpack.c.bf16 %v114_v53, %v113_v52 }
  0x68   :  { %714 = vmatpush3.bf16.msra.mxu1 %v713_v38  ;;  %v705_v60 = vpack.c.bf16 %v132_v55, %v131_v54  ;;  %v115_v61 = vld [vmem:[#allocation5 + $0x70] sm:$0xff]  ;;  %v116_v62 = vld [vmem:[#allocation5 + $0x78] sm:$0xff]  ;;  %v722_v63 = vpack.c.bf16 %v220_v58, %v219_v57  ;;  %v223_v6 = vld [vmem:[#allocation7 + $0x60] sm:$0xff] }
  0x69   :  { %715 = vmatprep.subr.bf16.mxu1 %v951_v0  ;;  %v221_v1 = vld [vmem:[#allocation7 + $0x50] sm:$0xff]  ;;  %v222_v2 = vld [vmem:[#allocation7 + $0x58] sm:$0xff]  ;;  %v707_v3 = vpack.c.bf16 %v116_v62, %v115_v61  ;;  %v224_v7 = vld [vmem:[#allocation7 + $0x68] sm:$0xff] }
  0x6a   :  { %692 = vmatpush3.bf16.msra.mxu0 %v691_v29  ;;  %v725_v4 = vpack.c.bf16 %v222_v2, %v221_v1  ;;  %v99_v5 = vld [vmem:[#allocation2] sm:$0xff]  ;;  %v728_v8 = vpack.c.bf16 %v224_v7, %v223_v6  ;;  %v226_v10 = vld [vmem:[#allocation7 + $0x78] sm:$0xff]  ;;  %v305_v13 = vld [vmem:[#allocation8] sm:$0xff] }
  0x6b   :  { %694 = vmatprep.subr.bf16.mxu0 %v693_v33  ;;  %v225_v9 = vld [vmem:[#allocation7 + $0x70] sm:$0xff]  ;;  %v306_v14 = vld [vmem:[#allocation8 + $0x8] sm:$0xff]  ;;  %v308_v17 = vld [vmem:[#allocation8 + $0x18] sm:$0xff] }
  0x6c   :  { %717 = vmatpush3.bf16.msra.mxu1 %v716_v47  ;;  %v731_v11 = vpack.c.bf16 %v226_v10, %v225_v9  ;;  %v307_v15 = vld [vmem:[#allocation8 + $0x10] sm:$0xff]  ;;  %v734_v16 = vpack.c.bf16 %v306_v14, %v305_v13  ;;  %v309_v19 = vld [vmem:[#allocation8 + $0x20] sm:$0xff]  ;;  %v310_v20 = vld [vmem:[#allocation8 + $0x28] sm:$0xff] }
  0x6d   :  { %718 = vmatprep.subr.bf16.mxu1 %v951_v0  ;;  %v737_v18 = vpack.c.bf16 %v308_v17, %v307_v15  ;;  %v740_v21 = vpack.c.bf16 %v310_v20, %v309_v19  ;;  %v311_v22 = vld [vmem:[#allocation8 + $0x30] sm:$0xff]  ;;  %v312_v23 = vld [vmem:[#allocation8 + $0x38] sm:$0xff]  ;;  %v313_v25 = vld [vmem:[#allocation8 + $0x40] sm:$0xff] }
  0x6e   :  { %696 = vmatpush3.bf16.msra.mxu0 %v695_v41  ;;  %v743_v24 = vpack.c.bf16 %v312_v23, %v311_v22  ;;  %v314_v26 = vld [vmem:[#allocation8 + $0x48] sm:$0xff]  ;;  %v315_v28 = vld [vmem:[#allocation8 + $0x50] sm:$0xff]  ;;  %v316_v29 = vld [vmem:[#allocation8 + $0x58] sm:$0xff] }
  0x6f   :  { %698 = vmatprep.subr.bf16.mxu0 %v697_v42  ;;  %v746_v27 = vpack.c.bf16 %v314_v26, %v313_v25  ;;  %v749_v30 = vpack.c.bf16 %v316_v29, %v315_v28  ;;  %v317_v31 = vld [vmem:[#allocation8 + $0x60] sm:$0xff]  ;;  %v318_v32 = vld [vmem:[#allocation8 + $0x68] sm:$0xff]  ;;  %v535_v35 = vld [vmem:[%s1116_s2] ss:$0 sm:$0xff] }
  0x70   :  { %720 = vmatpush3.bf16.msra.mxu1 %v719_v56  ;;  %v752_v33 = vpack.c.bf16 %v318_v32, %v317_v31  ;;  %v319_v40 = vld [vmem:[#allocation8 + $0x70] sm:$0xff]  ;;  %v320_v41 = vld [vmem:[#allocation8 + $0x78] sm:$0xff]  ;;  %v400_v43 = vld [vmem:[#allocation10 + $0x8] sm:$0xff] }
  0x71   :  { %721 = vmatprep.subr.bf16.mxu1 %v951_v0  ;;  %v755_v42 = vpack.c.bf16 %v320_v41, %v319_v40  ;;  %v402_v44 = vld [vmem:[#allocation10 + $0x18] sm:$0xff]  ;;  %v399_v45 = vld [vmem:[#allocation10] sm:$0xff]  ;;  %v404_v47 = vld [vmem:[#allocation10 + $0x28] sm:$0xff] }
  0x72   :  { %700 = vmatpush3.bf16.msra.mxu0 %v699_v50  ;;  %v757_v46 = vpack.c.bf16 %v402_v44, %v400_v43  ;;  %v406_v48 = vld [vmem:[#allocation10 + $0x38] sm:$0xff]  ;;  %v405_v52 = vld [vmem:[#allocation10 + $0x30] sm:$0xff]  ;;  %v408_v53 = vld [vmem:[#allocation10 + $0x48] sm:$0xff] }
  0x73   :  { %702 = vmatprep.subr.bf16.mxu0 %v701_v51  ;;  %v761_v50 = vpack.c.bf16 %v406_v48, %v404_v47  ;;  %v403_v51 = vld [vmem:[#allocation10 + $0x20] sm:$0xff]  ;;  %v410_v54 = vld [vmem:[#allocation10 + $0x58] sm:$0xff]  ;;  %v409_v58 = vld [vmem:[#allocation10 + $0x50] sm:$0xff] }
  0x74   :  { %723 = vmatpush3.bf16.msra.mxu1 %v722_v63  ;;  %v763_v55 = vpack.c.bf16 %v405_v52, %v403_v51  ;;  %v765_v56 = vpack.c.bf16 %v410_v54, %v408_v53  ;;  %v407_v57 = vld [vmem:[#allocation10 + $0x40] sm:$0xff]  ;;  %v413_v1 = vld [vmem:[#allocation10 + $0x70] sm:$0xff]  ;;  %v416_v2 = vld [vmem:[#allocation10 + $0x88] sm:$0xff] }
  0x75   :  { %724 = vmatprep.subr.bf16.mxu1 %v951_v0  ;;  %v767_v61 = vpack.c.bf16 %v409_v58, %v407_v57  ;;  %v411_v63 = vld [vmem:[#allocation10 + $0x60] sm:$0xff]  ;;  %v417_v7 = vld [vmem:[#allocation10 + $0x90] sm:$0xff]  ;;  %v422_v9 = vld [vmem:[#allocation10 + $0xb8] sm:$0xff] }
  0x76   :  { %704 = vmatpush3.bf16.msra.mxu0 %v703_v59  ;;  %v412_v59 = vld [vmem:[#allocation10 + $0x68] sm:$0xff]  ;;  %v415_v6 = vld [vmem:[#allocation10 + $0x80] sm:$0xff]  ;;  %v421_v13 = vld [vmem:[#allocation10 + $0xb0] sm:$0xff] }
  0x77   :  { %706 = vmatprep.subr.bf16.mxu0 %v705_v60  ;;  %v414_v60 = vld [vmem:[#allocation10 + $0x78] sm:$0xff]  ;;  %v775_v10 = vpack.c.bf16 %v417_v7, %v415_v6  ;;  %v424_v14 = vld [vmem:[#allocation10 + $0xc8] sm:$0xff]  ;;  %v425_v19 = vld [vmem:[#allocation10 + $0xd0] sm:$0xff] }
  0x78   :  { %726 = vmatpush3.bf16.msra.mxu1 %v725_v4  ;;  %v769_v62 = vpack.c.bf16 %v414_v60, %v412_v59  ;;  %v771_v4 = vpack.c.bf16 %v413_v1, %v411_v63  ;;  %v426_v15 = vld [vmem:[#allocation10 + $0xd8] sm:$0xff]  ;;  %v428_v26 = vld [vmem:[#allocation10 + $0xe8] sm:$0xff]  ;;  %v427_v29 = vld [vmem:[#allocation10 + $0xe0] sm:$0xff] }
  0x79   :  { %727 = vmatprep.subr.bf16.mxu1 %v951_v0  ;;  %v781_v17 = vpack.c.bf16 %v426_v15, %v424_v14  ;;  %v537_v32 = vld [vmem:[%s1120_s6] ss:$0 sm:$0xff]  ;;  %s524_s6 = sshll.u32 %s954_s13, 4  ;;  %s525_s6 = int_to_ptr.vmem [resolvable:$true] %s524_s6 }
  0x7a   :  { %708 = vmatpush3.bf16.msra.mxu0 %v707_v3  ;;  %v418_v3 = vld [vmem:[#allocation10 + $0x98] sm:$0xff]  ;;  %v431_v40 = vld [vmem:[%s1122_s8] sm:$0x3]  ;;  %s912_s1 = scalar_lea.vmem %s525_s6, 256  ;;  %p917_p13 = scmp.lt.s32.totalorder %s525_s6, %s525_s6 }
  0x7b   :  { %733 = vmatprep.subr.bf16.mxu0 %v951_v0  ;;  %p913_p12 = scmp.ne.s32.totalorder %s525_s6, %s912_s1  ;;  %p918_p0 = scmp.lt.s32.totalorder %s912_s1, %s912_s1 }
  0x7c   :  { %729 = vmatpush3.bf16.msra.mxu1 %v728_v8  ;;  %v420_v8 = vld [vmem:[#allocation10 + $0xa8] sm:$0xff] }
  0x7d   :  { %205 = vmatmul.mubr.f32.vlgmr.msra.gmra.mrb[0].mxu0 %v99_v5  ;;  %730 = vmatprep.subr.bf16.mxu1 %v951_v0  ;;  %v773_v5 = vpack.c.bf16 %v418_v3, %v416_v2  ;;  %p919_p1 = por %p918_p0, %p917_p13 }
  0x7e   :  { %674 = vmatprep.mubr.msk.f32.mxu0 %vm952_vm0, %v953_v12  ;;  %735 = vmatpush3.bf16.msra.mxu0 %v734_v16 }
  0x7f   :  { %736 = vmatprep.subr.bf16.mxu0 %v951_v0  ;;  %p920_p2 = pnand %p919_p1, %p913_p12 }
  0x80   :  { %732 = vmatpush3.bf16.msra.mxu1 %v731_v11  ;;  %v777_v11 = vpack.c.bf16 %v422_v9, %v420_v8 }
  0x81   :  { %758 = vmatprep.subr.bf16.mxu1 %v757_v46 }
  0x82   :  { %738 = vmatpush3.bf16.msra.mxu0 %v737_v18  ;;  %v423_v18 = vld [vmem:[#allocation10 + $0xc0] sm:$0xff] }
  0x83   :  { %739 = vmatprep.subr.bf16.mxu0 %v951_v0  ;;  %v783_v20 = vpack.c.bf16 %v425_v19, %v423_v18 }
  0x86   :  { %741 = vmatpush3.bf16.msra.mxu0 %v740_v21  ;;  %v536_v21 = vld [vmem:[%s1118_s4] ss:$0 sm:$0xff] }
  0x87   :  { %742 = vmatprep.subr.bf16.mxu0 %v951_v0 }
  0x8a   :  { %744 = vmatpush3.bf16.msra.mxu0 %v743_v24 }
  0x8b   :  { %745 = vmatprep.subr.bf16.mxu0 %v951_v0 }
  0x8e   :  { %747 = vmatpush3.bf16.msra.mxu0 %v746_v27  ;;  %v430_v27 = vld [vmem:[#allocation10 + $0xf8] sm:$0xff] }
  0x8f   :  { %748 = vmatprep.subr.bf16.mxu0 %v951_v0  ;;  %v785_v28 = vpack.c.bf16 %v430_v27, %v428_v26 }
  0x92   :  { %750 = vmatpush3.bf16.msra.mxu0 %v749_v30  ;;  %v429_v30 = vld [vmem:[#allocation10 + $0xf0] sm:$0xff] }
  0x93   :  { %751 = vmatprep.subr.bf16.mxu0 %v951_v0  ;;  %v787_v31 = vpack.c.bf16 %v429_v30, %v427_v29 }
  0x96   :  { %753 = vmatpush3.bf16.msra.mxu0 %v752_v33 }
  0x97   :  { %754 = vmatprep.subr.bf16.mxu0 %v951_v0  ;;  %v401_v0 = vld [vmem:[#allocation10 + $0x10] sm:$0xff] }
  0x98   :  { %v759_v49 = vpack.c.bf16 %v401_v0, %v399_v45 }
  0x9a   :  { %756 = vmatpush3.bf16.msra.mxu0 %v755_v42 }
 0x150   :  { %v570_v34 = vpop.f32.mrb[0].mxu0 }
 0x151   :  { %v571_v36 = vpop.f32.mrb[1].mxu0 }
 0x152   :  { %v572_v37 = vadd.f32 %v571_v36, %v570_v34 }
 0x154   :  { %v207_v38 = vadd.f32 %v572_v37, %v535_v35  ;;  %v433_v37 = vlaneseq }
 0x156   :  { %v210_v39 = vmax.f32 %v207_v38, 0.0  ;;  %v434_v38 = vshrl.u32 %v433_v37, 7 }
 0x158   :  { %640 = vmatmul.mubr.f32.vlgmr.msra.gmra.mrb[0].mxu1 %v210_v39  ;;  %v435_v39 = vsub.s32 0, %v434_v38  ;;  %v439_v41 = vsub.s32 1, %v434_v38 }
 0x159   :  { %507 = vmatprep.mubr.f32.mxu1 %v953_v12  ;;  %760 = vmatpush1.bf16.msra.mxu1 %v759_v49  ;;  %v419_v12 = vld [vmem:[#allocation10 + $0xa0] sm:$0xff] }
 0x15a   :  { %762 = vmatprep.subr.bf16.mxu1 %v761_v50  ;;  %v779_v16 = vpack.c.bf16 %v421_v13, %v419_v12  ;;  %v436_v42 = vrot.slane %v431_v40, %v435_v39  ;;  %v440_v43 = vrot.slane %v431_v40, %v439_v41 }
 0x15d   :  { %764 = vmatpush1.bf16.msra.mxu1 %v763_v55 }
 0x15e   :  { %766 = vmatprep.subr.bf16.mxu1 %v765_v56 }
 0x161   :  { %768 = vmatpush1.bf16.msra.mxu1 %v767_v61 }
 0x162   :  { %770 = vmatprep.subr.bf16.mxu1 %v769_v62 }
 0x165   :  { %772 = vmatpush1.bf16.msra.mxu1 %v771_v4 }
 0x166   :  { %774 = vmatprep.subr.bf16.mxu1 %v773_v5 }
 0x169   :  { %776 = vmatpush1.bf16.msra.mxu1 %v775_v10 }
 0x16a   :  { %778 = vmatprep.subr.bf16.mxu1 %v777_v11 }
 0x16d   :  { %780 = vmatpush1.bf16.msra.mxu1 %v779_v16 }
 0x16e   :  { %782 = vmatprep.subr.bf16.mxu1 %v781_v17 }
 0x171   :  { %784 = vmatpush1.bf16.msra.mxu1 %v783_v20 }
 0x172   :  { %786 = vmatprep.subr.bf16.mxu1 %v785_v28 }
 0x175   :  { %788 = vmatpush1.bf16.msra.mxu1 %v787_v31 }
 0x22b   :  { %v300_v22 = vpop.f32.mrb[0].mxu1 }
 0x22c   :  { %v301_v23 = vadd.f32 %v536_v21, %v300_v22  ;;  %v641_v24 = vpop.f32.mrb[1].mxu1 }
 0x22e   :  { %v304_v25 = vmax.f32 %v301_v23, 0.0 }
 0x230   :  { %675 = vmatmul.mubr.f32.vlgmr.msra.gmra.mrb[2].mxu0 %v304_v25 }
 0x303   :  { %v394_v33 = vpop.f32.mrb[2].mxu0 }
 0x304   :  { %v395_v34 = vadd.f32 %v537_v32, %v394_v33  ;;  %v676_v35 = vpop.f32.mrb[3].mxu0 }
 0x306   :  { %v398_v36 = vmax.f32 %v395_v34, 0.0 }
 0x308   :  { %508 = vmatmul.mubr.f32.vlgmr.msra.gmra.mrb[2].mxu1 %v398_v36 }
 0x3db   :  { %v509_v44 = vpop.f32.mrb[2].mxu1 }
 0x3dc   :  { %v510_v45 = vadd.f32 %v509_v44, %v436_v42  ;;  %v511_v46 = vpop.f32.mrb[3].mxu1 }
 0x3dd   :  { %v512_v0 = vadd.f32 %v511_v46, %v440_v43 }
 0x3de   :  { %v514_v47 = vmax.f32 %v510_v45, 0.0 }
 0x3df   :  { %v515_v48 = vmax.f32 %v512_v0, 0.0 }
 0x3e0   :  { %516 = vst [vmem:[#allocation11] sm:$0xff] %v514_v47 }
 0x3e1   :  { %517 = vst [vmem:[#allocation11 + $0x8] sm:$0xff] %v515_v48 }
 0x3e2   :  { %923 = shalt.err (!%p920_p2)
}
 0x3e3   :  { %s924_s14 = scalar_lea.hbm %s1123_s9, 256 }
 0x3e4   :  { %p925_p3 = scmp.ne.s32.totalorder %s1123_s9, %s924_s14  ;;  %p928_p4 = scmp.lt.u32.totalorder %s924_s14, %s1123_s9 }
 0x3e6   :  { %p930_p5 = pnand %p928_p4, %p925_p3 }
 0x3e8   :  { %933 = shalt.err (!%p930_p5)
}
 0x3e9   :  { %527 = dma.vmem_to_hbm [thread:$0]  %s525_s6, 256, %s1123_s9, [#allocation4]  }
 0x3ea   :  { %940 = dma.done.wait [#allocation4], 256  }
 0x3eb   :  { %941 = vsyncadd [#allocation4], 4294967040 }
 0x3ec   :  { %531 = vsyncpa [#allocation3], 1 }
 0x3ed   :  { %532 = vsyncpa [#allocation6], 1 }
 0x3ee   :  { %533 = vsyncpa [#allocation9], 1 }
 0x3ef   :  { %534 = vsyncpa [#allocation4], 1 }

</bundles_post_ra>
